<compile_context>
chip_gen: v7x
topology: tpu7x:2x2x1
jax: 0.10.0
libtpu: 0.0.40
codegen_flags: <defaults>
</compile_context>

<pallas_src>
import functools

import jax
import jax.numpy as jnp
from jax import lax
from jax.experimental import pallas as pl
from jax.experimental.pallas import tpu as pltpu


def _masked_nll_kernel(logp_ref, key_ref, psum_ref, pcnt_ref, sum_sc, cnt_sc,
                       *, n_rows, blocks_per_split):
    c = pl.program_id(0)          # parallel split (megacore)
    t = pl.program_id(1)          # reduction axis over row blocks of this split

    @pl.when(t == 0)
    def _():
        sum_sc[...] = jnp.zeros_like(sum_sc)
        cnt_sc[...] = jnp.zeros_like(cnt_sc)

    tn = logp_ref.shape[0]
    # Logical (unclamped) first row of this tile; may exceed n_rows for boundary /
    # clamped trailing blocks -> those rows are masked out below.
    row0 = (c * blocks_per_split + t) * tn

    logp = logp_ref[...].astype(jnp.float32)             # (tn, C), cast per tile in VMEM
    key = key_ref[...]                                   # (tn, 1) int32: target, or -1 = masked

    row = row0 + lax.broadcasted_iota(jnp.int32, (tn, 1), 0)
    in_range = row < n_rows                              # (tn, 1)
    valid = jnp.logical_and(key >= 0, in_range)          # (tn, 1)

    col = lax.broadcasted_iota(jnp.int32, logp.shape, 1)
    pick = jnp.logical_and(col == key, valid)            # (tn, C) one-hot of valid rows
    contrib = jnp.where(pick, logp, 0.0)                 # NaN-safe select (no mask multiply)

    # Cheap serial chain: only a (1, C) add and a (1, 1) add depend on the previous step.
    sum_sc[...] += jnp.sum(contrib, axis=0, keepdims=True)                    # (1, C)
    cnt_sc[...] += jnp.sum(valid.astype(jnp.float32), axis=0, keepdims=True)  # (1, 1)

    @pl.when(t == pl.num_programs(1) - 1)
    def _():
        psum_ref[...] = sum_sc[...].reshape(psum_ref.shape)   # (1, 1, C)
        pcnt_ref[...] = cnt_sc[...].reshape(pcnt_ref.shape)   # (1, 1, 1)


def masked_nll_loss(output_instances, instances, semantics, invalid_class,
                    *, tile_rows=None, num_splits=2, vmem_budget_bytes=10 << 20):
    """Pallas equivalent of MaskedNLLLoss.forward.

    output_instances: (N, C) float log-probabilities (f32 / bf16 streamed as-is)
    instances:        (N,)   int targets in [0, C)
    semantics:        (N,)   int labels used for masking
    invalid_class:    Python int or None (specialized at trace time)
    """
    N, C = output_instances.shape

    logp = output_instances
    if logp.dtype not in (jnp.float32, jnp.bfloat16):
        logp = logp.astype(jnp.float32)          # only f32/bf16 stream natively
    itemsize = jnp.dtype(logp.dtype).itemsize

    tgt = instances.astype(jnp.int32)
    if invalid_class is None:
        key = tgt                                 # every row valid (targets are >= 0)
    else:
        key = jnp.where(semantics.astype(jnp.int32) == int(invalid_class),
                        jnp.int32(-1), tgt)
    key2d = key.reshape(N, 1)                     # (N, 1) int32 side input

    if tile_rows is None:
        # VMEM per row for one buffer set: logp tile + lane-padded key tile (1 -> 128 lanes).
        # Double-buffered total stays ~2 * vmem_budget_bytes, well under the 32 MiB limit.
        bytes_per_row = C * itemsize + 128 * 4
        tile_rows = vmem_budget_bytes // bytes_per_row
    # TODO(synk): for enormous C (a single 8-row block already exceeding the VMEM budget),
    # add a grid axis tiling C; for tiny C a lane-dense metadata repack would cut the
    # 128x key-tile padding and allow even larger row tiles.
    tn = max(8, min(int(tile_rows), -(-N // max(1, num_splits))))
    tn = max(8, (tn // 8) * 8)                    # sublane multiple

    total_blocks = -(-N // tn)
    num_splits = max(1, min(num_splits, total_blocks))
    T = -(-total_blocks // num_splits)            # row blocks per split
    last_block = total_blocks - 1

    def row_map(c, t):
        # Clamp fully-out-of-range trailing blocks onto the last real block; the kernel's
        # logical-row mask (row0 >= N) zeroes their contribution.
        return (jnp.minimum(c * T + t, last_block), 0)

    kernel = functools.partial(_masked_nll_kernel, n_rows=N, blocks_per_split=T)

    psum, pcnt = pl.pallas_call(
        kernel,
        out_shape=[jax.ShapeDtypeStruct((num_splits, 1, C), jnp.float32),
                   jax.ShapeDtypeStruct((num_splits, 1, 1), jnp.float32)],
        grid=(num_splits, T),
        in_specs=[pl.BlockSpec((tn, C), row_map),
                  pl.BlockSpec((tn, 1), row_map)],
        out_specs=[pl.BlockSpec((1, 1, C), lambda c, t: (c, 0, 0)),
                   pl.BlockSpec((1, 1, 1), lambda c, t: (c, 0, 0))],
        scratch_shapes=[pltpu.VMEM((1, C), jnp.float32),
                        pltpu.VMEM((1, 1), jnp.float32)],
        compiler_params=pltpu.CompilerParams(
            dimension_semantics=("parallel", "arbitrary"),
            vmem_limit_bytes=32 * 1024 * 1024),
    )(logp, key2d)

    # NLLLoss(reduction='mean'): -mean of picked log-probs over unmasked rows.
    # (Empty selection -> 0/0 -> nan, matching PyTorch's mean over an empty tensor.)
    return -jnp.sum(psum) / jnp.sum(pcnt)


def _reference(logp, tgt, sem, invalid_class):
    logp = logp.astype(jnp.float32)
    picked = jnp.take_along_axis(logp, tgt[:, None].astype(jnp.int32), axis=1)[:, 0]
    if invalid_class is None:
        mask = jnp.ones(tgt.shape, dtype=bool)
    else:
        mask = sem != invalid_class
    return -jnp.sum(jnp.where(mask, picked, 0.0)) / jnp.sum(mask)


if __name__ == "__main__":
    key = jax.random.PRNGKey(0)
    k1, k2, k3 = jax.random.split(key, 3)

    N, C = 200, 16                                    # N deliberately not tile-aligned
    logits = jax.random.normal(k1, (N, C), dtype=jnp.float32)
    logp = jax.nn.log_softmax(logits, axis=-1)        # NLLLoss expects log-probs
    instances = jax.random.randint(k2, (N,), 0, C, dtype=jnp.int32)
    semantics = jax.random.randint(k3, (N,), 0, 6, dtype=jnp.int32)
    invalid_class = 3

    # Masked path (f32).
    loss_masked = jax.block_until_ready(
        masked_nll_loss(logp, instances, semantics, invalid_class))
    ref_masked = _reference(logp, instances, semantics, invalid_class)
    assert jnp.allclose(loss_masked, ref_masked, rtol=1e-5, atol=1e-5), (loss_masked, ref_masked)

    # invalid_class is None path.
    loss_plain = jax.block_until_ready(
        masked_nll_loss(logp, instances, semantics, None))
    ref_plain = _reference(logp, instances, semantics, None)
    assert jnp.allclose(loss_plain, ref_plain, rtol=1e-5, atol=1e-5), (loss_plain, ref_plain)

    # bf16 log-probs stream straight through (no wrapper up-cast / extra HBM copy).
    logp_bf16 = logp.astype(jnp.bfloat16)
    loss_bf16 = jax.block_until_ready(
        masked_nll_loss(logp_bf16, instances, semantics, invalid_class))
    ref_bf16 = _reference(logp_bf16, instances, semantics, invalid_class)
    assert jnp.allclose(loss_bf16, ref_bf16, rtol=1e-3, atol=1e-3), (loss_bf16, ref_bf16)

    # Small tile / multi-block path (exercises boundary masking + clamped trailing block).
    loss_small_tile = jax.block_until_ready(
        masked_nll_loss(logp, instances, semantics, invalid_class, tile_rows=24))
    assert jnp.allclose(loss_small_tile, ref_masked, rtol=1e-5, atol=1e-5), (loss_small_tile, ref_masked)

    print("KERNEL_OK")
</pallas_src>

<mosaic_0001>
module attributes {stable_mosaic.version = 11 : i64} {
  func.func @_masked_nll_kernel(%arg0: i32, %arg1: i32, %arg2: memref<96x16xf32, #tpu.memory_space<vmem>>, %arg3: memref<96x1xi32, #tpu.memory_space<vmem>>, %arg4: memref<1x1x16xf32, #tpu.memory_space<vmem>>, %arg5: memref<1x1x1xf32, #tpu.memory_space<vmem>>, %arg6: memref<1x16xf32, #tpu.memory_space<vmem>>, %arg7: memref<1x1xf32, #tpu.memory_space<vmem>>) attributes {dimension_semantics = [#tpu.dimension_semantics<parallel>, #tpu.dimension_semantics<arbitrary>], iteration_bounds = array<i64: 2, 2>, scalar_prefetch = 0 : i64, scratch_operands = 2 : i64, tpu.core_type = #tpu.core_type<tc>, window_params = [{transform_indices = @transform_0, window_bounds = array<i64: 96, 16>}, {transform_indices = @transform_1, window_bounds = array<i64: 96, 1>}, {transform_indices = @transform_2, window_bounds = array<i64: 1, 1, 16>}, {transform_indices = @transform_3, window_bounds = array<i64: 1, 1, 1>}]} {
    %c0_i32 = arith.constant 0 : i32
    %0 = arith.cmpi eq, %arg1, %c0_i32 : i32
    %1 = arith.extui %0 : i1 to i32
    %c0_i32_0 = arith.constant 0 : i32
    %2 = arith.cmpi ne, %1, %c0_i32_0 : i32
    scf.if %2 {
      %cst_16 = arith.constant 0.000000e+00 : f32
      %38 = vector.broadcast %cst_16 : f32 to vector<1x16xf32>
      %c0_17 = arith.constant 0 : index
      %c0_18 = arith.constant 0 : index
      %39 = vector.load %arg6[%c0_17, %c0_18] : memref<1x16xf32, #tpu.memory_space<vmem>>, vector<1x16xf32>
      tpu.vector_store %arg6[%c0_17, %c0_18], %38 {strides = array<i32>} : memref<1x16xf32, #tpu.memory_space<vmem>>, vector<1x16xf32>,
      %cst_19 = arith.constant 0.000000e+00 : f32
      %40 = vector.broadcast %cst_19 : f32 to vector<1x1xf32>
      %c0_20 = arith.constant 0 : index
      %c0_21 = arith.constant 0 : index
      %41 = vector.load %arg7[%c0_20, %c0_21] : memref<1x1xf32, #tpu.memory_space<vmem>>, vector<1x1xf32>
      tpu.vector_store %arg7[%c0_20, %c0_21], %40 {strides = array<i32>} : memref<1x1xf32, #tpu.memory_space<vmem>>, vector<1x1xf32>,
    } else {
    }
    %c2_i32 = arith.constant 2 : i32
    %3 = arith.muli %arg0, %c2_i32 : i32
    %4 = arith.addi %3, %arg1 : i32
    %c96_i32 = arith.constant 96 : i32
    %5 = arith.muli %4, %c96_i32 : i32
    %c0 = arith.constant 0 : index
    %c0_1 = arith.constant 0 : index
    %6 = vector.load %arg2[%c0, %c0_1] : memref<96x16xf32, #tpu.memory_space<vmem>>, vector<96x16xf32>
    %c0_2 = arith.constant 0 : index
    %c0_3 = arith.constant 0 : index
    %7 = vector.load %arg3[%c0_2, %c0_3] : memref<96x1xi32, #tpu.memory_space<vmem>>, vector<96x1xi32>
    %8 = tpu.iota {dimensions = array<i32: 0>} : vector<96x1xi32>
    %9 = vector.broadcast %5 : i32 to vector<96x1xi32>
    %10 = arith.addi %9, %8 : vector<96x1xi32>
    %c200_i32 = arith.constant 200 : i32
    %11 = vector.broadcast %c200_i32 : i32 to vector<96x1xi32>
    %12 = arith.cmpi slt, %10, %11 : vector<96x1xi32>
    %c0_i32_4 = arith.constant 0 : i32
    %13 = vector.broadcast %c0_i32_4 : i32 to vector<96x1xi32>
    %14 = arith.cmpi sge, %7, %13 : vector<96x1xi32>
    %15 = arith.andi %14, %12 : vector<96x1xi1>
    %16 = tpu.iota {dimensions = array<i32: 1>} : vector<96x16xi32>
    %17 = vector.broadcast %7 : vector<96x1xi32> to vector<96x16xi32>
    %18 = arith.cmpi eq, %16, %17 : vector<96x16xi32>
    %19 = vector.broadcast %15 : vector<96x1xi1> to vector<96x16xi1>
    %20 = arith.andi %18, %19 : vector<96x16xi1>
    %cst = arith.constant 0.000000e+00 : f32
    %21 = vector.broadcast %cst : f32 to vector<96x16xf32>
    %22 = arith.select %20, %6, %21 : vector<96x16xi1>, vector<96x16xf32>
    %c0_5 = arith.constant 0 : index
    %c0_6 = arith.constant 0 : index
    %23 = vector.load %arg6[%c0_5, %c0_6] : memref<1x16xf32, #tpu.memory_space<vmem>>, vector<1x16xf32>
    %cst_7 = arith.constant dense<0.000000e+00> : vector<16xf32>
    %24 = vector.multi_reduction <add>, %22, %cst_7 [0] : vector<96x16xf32> to vector<16xf32>
    %25 = vector.shape_cast %24 : vector<16xf32> to vector<1x16xf32>
    %26 = arith.addf %23, %25 : vector<1x16xf32>
    %c0_8 = arith.constant 0 : index
    %c0_9 = arith.constant 0 : index
    %27 = vector.load %arg6[%c0_8, %c0_9] : memref<1x16xf32, #tpu.memory_space<vmem>>, vector<1x16xf32>
    tpu.vector_store %arg6[%c0_8, %c0_9], %26 {strides = array<i32>} : memref<1x16xf32, #tpu.memory_space<vmem>>, vector<1x16xf32>,
    %c0_10 = arith.constant 0 : index
    %c0_11 = arith.constant 0 : index
    %28 = vector.load %arg7[%c0_10, %c0_11] : memref<1x1xf32, #tpu.memory_space<vmem>>, vector<1x1xf32>
    %29 = arith.extui %15 : vector<96x1xi1> to vector<96x1xi32>
    %30 = arith.sitofp %29 : vector<96x1xi32> to vector<96x1xf32>
    %cst_12 = arith.constant dense<0.000000e+00> : vector<1xf32>
    %31 = vector.multi_reduction <add>, %30, %cst_12 [0] : vector<96x1xf32> to vector<1xf32>
    %32 = vector.shape_cast %31 : vector<1xf32> to vector<1x1xf32>
    %33 = arith.addf %28, %32 : vector<1x1xf32>
    %c0_13 = arith.constant 0 : index
    %c0_14 = arith.constant 0 : index
    %34 = vector.load %arg7[%c0_13, %c0_14] : memref<1x1xf32, #tpu.memory_space<vmem>>, vector<1x1xf32>
    tpu.vector_store %arg7[%c0_13, %c0_14], %33 {strides = array<i32>} : memref<1x1xf32, #tpu.memory_space<vmem>>, vector<1x1xf32>,
    %c1_i32 = arith.constant 1 : i32
    %35 = arith.cmpi eq, %arg1, %c1_i32 : i32
    %36 = arith.extui %35 : i1 to i32
    %c0_i32_15 = arith.constant 0 : i32
    %37 = arith.cmpi ne, %36, %c0_i32_15 : i32
    scf.if %37 {
      %c0_16 = arith.constant 0 : index
      %c0_17 = arith.constant 0 : index
      %38 = vector.load %arg6[%c0_16, %c0_17] : memref<1x16xf32, #tpu.memory_space<vmem>>, vector<1x16xf32>
      %39 = vector.shape_cast %38 : vector<1x16xf32> to vector<1x1x16xf32>
      %c0_18 = arith.constant 0 : index
      %c0_19 = arith.constant 0 : index
      %c0_20 = arith.constant 0 : index
      %40 = vector.load %arg4[%c0_18, %c0_19, %c0_20] : memref<1x1x16xf32, #tpu.memory_space<vmem>>, vector<1x1x16xf32>
      tpu.vector_store %arg4[%c0_18, %c0_19, %c0_20], %39 {strides = array<i32>} : memref<1x1x16xf32, #tpu.memory_space<vmem>>, vector<1x1x16xf32>,
      %c0_21 = arith.constant 0 : index
      %c0_22 = arith.constant 0 : index
      %41 = vector.load %arg7[%c0_21, %c0_22] : memref<1x1xf32, #tpu.memory_space<vmem>>, vector<1x1xf32>
      %42 = vector.shape_cast %41 : vector<1x1xf32> to vector<1x1x1xf32>
      %c0_23 = arith.constant 0 : index
      %c0_24 = arith.constant 0 : index
      %c0_25 = arith.constant 0 : index
      %43 = vector.load %arg5[%c0_23, %c0_24, %c0_25] : memref<1x1x1xf32, #tpu.memory_space<vmem>>, vector<1x1x1xf32>
      tpu.vector_store %arg5[%c0_23, %c0_24, %c0_25], %42 {strides = array<i32>} : memref<1x1x1xf32, #tpu.memory_space<vmem>>, vector<1x1x1xf32>,
    } else {
    }
    return
  }
  func.func @transform_0(%arg0: i32, %arg1: i32) -> (i32, i32) {
    %c2_i32 = arith.constant 2 : i32
    %0 = arith.muli %arg0, %c2_i32 : i32
    %1 = arith.addi %0, %arg1 : i32
    %c2_i32_0 = arith.constant 2 : i32
    %2 = arith.minsi %1, %c2_i32_0 : i32
    %c0_i32 = arith.constant 0 : i32
    %c0_i32_1 = arith.constant 0 : i32
    return %2, %c0_i32 : i32, i32
  }
  func.func @transform_1(%arg0: i32, %arg1: i32) -> (i32, i32) {
    %c2_i32 = arith.constant 2 : i32
    %0 = arith.muli %arg0, %c2_i32 : i32
    %1 = arith.addi %0, %arg1 : i32
    %c2_i32_0 = arith.constant 2 : i32
    %2 = arith.minsi %1, %c2_i32_0 : i32
    %c0_i32 = arith.constant 0 : i32
    %c0_i32_1 = arith.constant 0 : i32
    return %2, %c0_i32 : i32, i32
  }
  func.func @transform_2(%arg0: i32, %arg1: i32) -> (i32, i32, i32) {
    %c0_i32 = arith.constant 0 : i32
    %c0_i32_0 = arith.constant 0 : i32
    %c0_i32_1 = arith.constant 0 : i32
    return %arg0, %c0_i32, %c0_i32_0 : i32, i32, i32
  }
  func.func @transform_3(%arg0: i32, %arg1: i32) -> (i32, i32, i32) {
    %c0_i32 = arith.constant 0 : i32
    %c0_i32_0 = arith.constant 0 : i32
    %c0_i32_1 = arith.constant 0 : i32
    return %arg0, %c0_i32, %c0_i32_0 : i32, i32, i32
  }
}

</mosaic_0001>

<bundles_post_ra>
// kernel: tpu_custom_call.1
= control target key start
LH: loop header
LB: loop body
LE: loop exit
PB: predicated region body
PF: predicated region fallthrough
CT: control target
= control target key end

     0   :  { %9 = vsyncpa [#allocation5], 0  ;;  %s1419_s0 = inlined_call_operand.vmem [shape: f32[200,16], index: 0, kind: input, shape index: {}]   ;;  %s1420_s1 = inlined_call_operand.vmem [shape: s32[200,1], index: 1, kind: input, shape index: {}]   ;;  %s1421_s2 = inlined_call_operand.hbm [shape: f32[2,1,16], index: 2, kind: output, shape index: {0}]   ;;  %s1422_s3 = inlined_call_operand.vmem [shape: f32[2,1,1], index: 3, kind: output, shape index: {1}]  }
   0x1   :  { %11 = vsyncpa [#allocation5 + $0x1], 0  ;;  %s971_s12 = smov 0   ;;  %s973_s13 = smov 0  }
   0x2   :  { %s975_s14 = smov 0   ;;  %s977_s15 = smov 0  }
   0x3   :  { %s979_s16 = smov 0   ;;  %s981_s17 = smov 0  }
   0x4   :  { %s983_s18 = smov 0   ;;  %s985_s19 = smov 0  }
   0x5 LB: > { %s744_s20 = sadd.s32 4294967295, %s945_s19   ;;  %s745_s21 = sadd.s32 4294967294, %s945_s19   ;;  %s945_s19 = sphi %s985_s19, %s17_s19   ;;  %s941_s18 = sphi %s983_s18, %s1476_s18   ;;  %s937_s17 = sphi %s981_s17, %s1475_s17   ;;  %s933_s16 = sphi %s979_s16, %s1474_s16   ;;  %s929_s15 = sphi %s977_s15, %s1473_s15   ;;  %s925_s14 = sphi %s975_s14, %s1472_s14   ;;  %s921_s13 = sphi %s973_s13, %s1471_s13   ;;  %s917_s12 = sphi %s971_s12, %s1470_s12  }
   0x6   : > { %s26_s22 = sadd.s32 1, %s937_s17  ;;  %s29_s23 = sadd.s32 1, %s941_s18 }
   0x7   : > { %p27_p0 = scmp.ge.s32.totalorder %s26_s22, 2  ;;  %p114_p1 = scmp.ne.s32.totalorder %s925_s14, %s921_s13 }
   0x8   : > { %p115_p2 = scmp.eq.s32.totalorder %s744_s20, 3  ;;  %p120_p4 = scmp.ne.s32.totalorder %s921_s13, %s917_s12 }
   0x9   : > { %s1478_s22 = smov (%p27_p0, %s26_s22), 0  ;;  %s1480_s23 = smov (!%p27_p0, %s29_s23), %s941_s18 }
   0xa   : > { %1424 = sst [smem:[#allocation7_spill]] %s1478_s22  ;;  %p1020_p3 = por %p115_p2, %p114_p1 }
   0xb   : > { %p31_p5 = scmp.ge.s32.totalorder %s1480_s23, 2  ;;  %p121_p6 = scmp.eq.s32.totalorder %s745_s21, 3 }
   0xc   : > { %p752_p7 = scmp.ge.s32.totalorder %s945_s19, 1  ;;  %p215_p8 = scmp.lt.s32.totalorder %s945_s19, 5 }
   0xd   : > { %s1482_s23 = smov (%p31_p5, %s1480_s23), 0  ;;  %p1030_p9 = por %p121_p6, %p120_p4 }
   0xe   : > { %1426 = sst [smem:[#allocation8_spill]] %s1482_s23  ;;  %p216_p10 = pnand %p752_p7, %p215_p8 }
   0xf   : > { %s101_s26 = ssub.s32 %s941_s18, %s1482_s23  ;;  %s104_s27 = sadd.s32 1, %s925_s14 }
  0x10   : > { %p102_p11 = scmp.eq.s32.totalorder %s101_s26, 0  ;;  %219 = sbr.rel (%p216_p10) target bundleno = 268 (0x10c), region = 28 }
  0x11   : > { %s753_s30 = sshll.u32 (!%p216_p10), %s933_s16, 1  ;;  %p306_p13 = scmp.lt.s32.totalorder (!%p216_p10), %s933_s16, 1 }
  0x12   : > { %s1038_s28 = scalar_select %p102_p11, %s925_s14, %s104_s27  }
  0x13   : > { %s1043_s4 = sadd.s32 (!%p216_p10), %s929_s15, %s753_s30  ;;  %s1428_s23 = sand.u32 (!%p216_p10), 1, %s921_s13  }
  0x14   : > { %p264_p12 = scmp.lt.s32.totalorder (!%p216_p10), %s1043_s4, 2  ;;  %s1067_s22 = scalar_lea.vmem (!%p216_p10), [#allocation4], %s1428_s23 }
  0x15   : > { %p757_p1 = scmp.ne.s32.totalorder (!%p216_p10), %s929_s15, 0 }
  0x17   : > { %s265_s5 = scalar_select %p264_p12, %s1043_s4, 2 }
  0x18   : > { %s1049_s6 = scalar_select %p306_p13, %s933_s16, 1 }
  0x19   : > { %s266_s7 = smul.u32 12, %s265_s5  ;;  %vm313_vm0 = vcmask (!%p757_p1), 122880   ;;  %vm315_vm1 = vcmask (!%p757_p1), 0   ;;  %v947_v0 = vmov (!%p757_p1), 0.0  }
  0x1a   : > { %s308_s10 = scalar_lea.vmem %s1422_s3, %s1049_s6  ;;  %312 = sbr.rel (%p757_p1) target bundleno = 33 (0x21), region = 32  ;;  %314 = vst.msk [vmem:[#allocation2] sm:$0x1] (!%p757_p1), %vm313_vm0, %v947_v0 }
  0x1b   : > { %p271_p0 = scmp.lt.s32.totalorder %s266_s7, 24  ;;  %316 = vst.msk [vmem:[#allocation3] sm:$0x1] (!%p757_p1), %vm315_vm1, %v947_v0 }
  0x1d   : > { %s1484_s7 = smov (!%p271_p0, %s266_s7), 24 }
  0x1e   : > { %s754_s11 = sshll.u32 %s1484_s7, 3 }
  0x1f   : > { %s1058_s26 = scalar_lea.vmem %s1419_s0, %s754_s11  ;;  %s1063_s29 = scalar_lea.vmem %s1420_s1, %s754_s11 }
  0x21 PF: > { %v332_v1 = vld [vmem:[%s1063_s29] sm:$0xff]  ;;  %s319_s5 = smul.u32 96, %s1043_s4  ;;  %v344_v2 = vlaneseq  ;;  %v948_v3 = vmov 0   ;;  %v333_v4 = vld [vmem:[%s1063_s29 + $0x8] sm:$0xff]  ;;  %vm587_vm2 = vcmask 7168   ;;  %v334_v7 = vld [vmem:[%s1063_s29 + $0x10] sm:$0xff] }
  0x22   : > { %849 = vset.pattern.permute.xlu0 %v948_v3  ;;  %850 = vset.pattern.permute.xlu1 %v948_v3  ;;  %v335_v8 = vld [vmem:[%s1063_s29 + $0x18] sm:$0xff]  ;;  %vm382_vm3 = vcmp.ge.s32.totalorder %v332_v1, 0  ;;  %vm383_vm4 = vcmp.ge.s32.totalorder %v333_v4, 0  ;;  %vm384_vm5 = vcmp.ge.s32.totalorder %v334_v7, 0  ;;  %v1087_v12 = vld [vmem:[%s1063_s29 + $0x20] sm:$0xff]  ;;  %v949_v25 = vmov 0.0  }
  0x23   : > { %409 = vperm.xlu0 %849, %v332_v1   ;;  %v1076_v5 = vshrl.u32 %v344_v2, 7  ;;  %v1078_v6 = vstv %s319_s5  ;;  %vm385_vm6 = vcmp.ge.s32.totalorder %v335_v8, 0  ;;  %vm386_vm7 = vcmp.ge.s32.totalorder %v1087_v12, 0  ;;  %v1105_v27 = vld [vmem:[%s1063_s29 + $0x28] sm:$0xff]  ;;  %v1118_v32 = vld [vmem:[%s1063_s29 + $0x30] sm:$0xff]  ;;  %v1143_v41 = vld [vmem:[%s1063_s29 + $0x38] sm:$0xff] }
  0x24   : > { %vm387_vm14 = vcmp.ge.s32.totalorder %v1105_v27, 0  ;;  %v340_v50 = vld [vmem:[%s1063_s29 + $0x40] sm:$0xff]  ;;  %v341_v61 = vld [vmem:[%s1063_s29 + $0x48] sm:$0xff]  ;;  %v342_v1 = vld [vmem:[%s1063_s29 + $0x50] sm:$0xff]  ;;  %p771_p2 = scmp.ne.s32.totalorder %s929_s15, 1 }
  0x25   : > { %v358_v9 = vadd.s32 %v1078_v6, %v1076_v5  ;;  %v346_v10 = vadd.s32 8, %v1076_v5  ;;  %v347_v11 = vadd.s32 16, %v1076_v5  ;;  %v348_v13 = vadd.s32 24, %v1076_v5  ;;  %v321_v56 = vld [vmem:[%s1058_s26 + $0x8] sm:$0xff] }
  0x26   : > { %v349_v14 = vadd.s32 32, %v1076_v5  ;;  %v350_v15 = vadd.s32 40, %v1076_v5  ;;  %v351_v16 = vadd.s32 48, %v1076_v5  ;;  %v352_v23 = vadd.s32 56, %v1076_v5 }
  0x27   : > { %412 = vperm.xlu0 %849, %v333_v4   ;;  %vm370_vm8 = vcmp.lt.s32.totalorder %v358_v9, 200  ;;  %v359_v17 = vadd.s32 %v1078_v6, %v346_v10  ;;  %v360_v18 = vadd.s32 %v1078_v6, %v347_v11  ;;  %v361_v19 = vadd.s32 %v1078_v6, %v348_v13  ;;  %v343_v13 = vld [vmem:[%s1063_s29 + $0x58] sm:$0xff] }
  0x28   : > { %vm394_vm9 = vmand %vm382_vm3, %vm370_vm8  ;;  %v362_v20 = vadd.s32 %v1078_v6, %v349_v14  ;;  %v363_v21 = vadd.s32 %v1078_v6, %v350_v15  ;;  %v364_v22 = vadd.s32 %v1078_v6, %v351_v16  ;;  %v365_v33 = vadd.s32 %v1078_v6, %v352_v23  ;;  %v325_v15 = vld [vmem:[%s1058_s26 + $0x28] sm:$0xff] }
  0x29   : > { %v456_v24 = vsel %vm394_vm9, 1, %v948_v3  ;;  %v759_v26 = vsel %vm394_vm9, 1.0, %v949_v25  ;;  %vm371_vm10 = vcmp.lt.s32.totalorder %v359_v17, 200  ;;  %vm372_vm11 = vcmp.lt.s32.totalorder %v360_v18, 200 }
  0x2a   : > { %v588_v28 = vsel %vm587_vm2, %v759_v26, 0.0  ;;  %469 = vperm.xlu1 %850, %v456_v24   ;;  %vm395_vm12 = vmand %vm383_vm4, %vm371_vm10  ;;  %vm373_vm13 = vcmp.lt.s32.totalorder %v361_v19, 200  ;;  %vm374_vm15 = vcmp.lt.s32.totalorder %v362_v20, 200  ;;  %vm375_vm1 = vcmp.lt.s32.totalorder %v363_v21, 200 }
  0x2b   : > { %415 = vperm.xlu0 %849, %v334_v7   ;;  %v457_v29 = vsel %vm395_vm12, 1, %v948_v3  ;;  %v760_v30 = vsel %vm395_vm12, 1.0, %v949_v25  ;;  %vm1113_vm0 = vmand %vm384_vm5, %vm372_vm11  ;;  %vm388_vm4 = vcmp.ge.s32.totalorder %v1118_v32, 0  ;;  %vm377_vm9 = vcmp.lt.s32.totalorder %v365_v33, 200 }
  0x2c   : > { %v589_v34 = vsel %vm587_vm2, %v760_v30, 0.0  ;;  %v761_v35 = vsel %vm1113_vm0, 1.0, %v949_v25  ;;  %vm1126_vm3 = vmand %vm385_vm6, %vm373_vm13  ;;  %vm376_vm6 = vcmp.lt.s32.totalorder %v364_v22, 200  ;;  %v458_v45 = vsel %vm1113_vm0, 1, %v948_v3 }
  0x2d   : > { %v590_v37 = vadd.f32 %v589_v34, %v588_v28  ;;  %v591_v38 = vsel %vm587_vm2, %v761_v35, 0.0  ;;  %v762_v39 = vsel %vm1126_vm3, 1.0, %v949_v25  ;;  %vm1138_vm5 = vmand %vm386_vm7, %vm374_vm15  ;;  %vm389_vm7 = vcmp.ge.s32.totalorder %v1143_v41, 0 }
  0x2e   : > { %472 = vperm.xlu1 %850, %v457_v29   ;;  %v593_v42 = vsel %vm587_vm2, %v762_v39, 0.0  ;;  %v763_v43 = vsel %vm1138_vm5, 1.0, %v949_v25  ;;  %vm1152_vm8 = vmand %vm387_vm14, %vm375_vm1  ;;  %v353_v51 = vadd.s32 64, %v1076_v5  ;;  %vm390_vm11 = vcmp.ge.s32.totalorder %v340_v50, 0  ;;  %v574_v39 = vld [vmem:[#allocation3] sm:$0x1] }
  0x2f   : > { %418 = vperm.xlu0 %849, %v335_v8   ;;  %v592_v46 = vadd.f32 %v591_v38, %v590_v37  ;;  %v764_v47 = vsel %vm1152_vm8, 1.0, %v949_v25  ;;  %v595_v48 = vsel %vm587_vm2, %v763_v43, 0.0  ;;  %vm1166_vm10 = vmand %vm388_vm4, %vm376_vm6  ;;  %v459_v54 = vsel %vm1126_vm3, 1, %v948_v3 }
  0x30   : > { %v765_v53 = vsel %vm1166_vm10, 1.0, %v949_v25  ;;  %v597_v55 = vsel %vm587_vm2, %v764_v47, 0.0  ;;  %vm1181_vm12 = vmand %vm389_vm7, %vm377_vm9  ;;  %v366_v57 = vadd.s32 %v1078_v6, %v353_v51  ;;  %v354_v58 = vadd.s32 72, %v1076_v5 }
  0x31   : > { %v594_v52 = vadd.f32 %v593_v42, %v592_v46  ;;  %v766_v60 = vsel %vm1181_vm12, 1.0, %v949_v25  ;;  %v355_v62 = vadd.s32 80, %v1076_v5  ;;  %v356_v63 = vadd.s32 88, %v1076_v5 }
  0x32   : > { %475 = vperm.xlu1 %850, %v458_v45   ;;  %v599_v0 = vsel %vm587_vm2, %v765_v53, 0.0  ;;  %vm391_vm13 = vcmp.ge.s32.totalorder %v341_v61, 0  ;;  %vm378_vm14 = vcmp.lt.s32.totalorder %v366_v57, 200  ;;  %v367_v4 = vadd.s32 %v1078_v6, %v354_v58 }
  0x33   : > { %421 = vperm.xlu0 %849, %v1087_v12   ;;  %v596_v59 = vadd.f32 %v595_v48, %v594_v52  ;;  %vm1198_vm15 = vmand %vm390_vm11, %vm378_vm14  ;;  %vm392_vm0 = vcmp.ge.s32.totalorder %v342_v1, 0  ;;  %v368_v9 = vadd.s32 %v1078_v6, %v355_v62  ;;  %v369_v10 = vadd.s32 %v1078_v6, %v356_v63 }
  0x34   : > { %v460_v5 = vsel %vm1138_vm5, 1, %v948_v3  ;;  %v601_v11 = vsel %vm587_vm2, %v766_v60, 0.0  ;;  %v767_v12 = vsel %vm1198_vm15, 1.0, %v949_v25  ;;  %vm379_vm1 = vcmp.lt.s32.totalorder %v367_v4, 200  ;;  %v320_v60 = vld [vmem:[%s1058_s26] sm:$0xff] }
  0x35   : > { %v598_v7 = vadd.f32 %v597_v55, %v596_v59  ;;  %vm1214_vm3 = vmand %vm391_vm13, %vm379_vm1  ;;  %vm393_vm4 = vcmp.ge.s32.totalorder %v343_v13, 0  ;;  %vm380_vm6 = vcmp.lt.s32.totalorder %v368_v9, 200  ;;  %vm381_vm7 = vcmp.lt.s32.totalorder %v369_v10, 200 }
  0x36   : > { %478 = vperm.xlu1 %850, %v459_v54   ;;  %v603_v6 = vsel %vm587_vm2, %v767_v12, 0.0  ;;  %v768_v16 = vsel %vm1214_vm3, 1.0, %v949_v25  ;;  %vm1223_vm5 = vmand %vm392_vm0, %vm380_vm6  ;;  %v461_v22 = vsel %vm1152_vm8, 1, %v948_v3  ;;  %v462_v29 = vsel %vm1166_vm10, 1, %v948_v3 }
  0x37   : > { %424 = vperm.xlu0 %849, %v1105_v27   ;;  %v600_v14 = vadd.f32 %v599_v0, %v598_v7  ;;  %v769_v19 = vsel %vm1223_vm5, 1.0, %v949_v25  ;;  %v605_v20 = vsel %vm587_vm2, %v768_v16, 0.0  ;;  %vm1231_vm9 = vmand %vm393_vm4, %vm381_vm7  ;;  %v464_v34 = vsel %vm1198_vm15, 1, %v948_v3  ;;  %v323_v0 = vld [vmem:[%s1058_s26 + $0x18] sm:$0xff] }
  0x38   : > { %v770_v24 = vsel %vm1231_vm9, 1.0, %v949_v25  ;;  %v607_v26 = vsel %vm587_vm2, %v769_v19, 0.0  ;;  %v463_v25 = vsel %vm1181_vm12, 1, %v948_v3  ;;  %v465_v37 = vsel %vm1214_vm3, 1, %v948_v3 }
  0x39   : > { %v602_v18 = vadd.f32 %v601_v11, %v600_v14  ;;  %v609_v28 = vsel %vm587_vm2, %v770_v24, 0.0  ;;  %vm618_vm2 = vcmask 0   ;;  %v467_v43 = vsel %vm1231_vm9, 1, %v948_v3 }
  0x3a   : > { %481 = vperm.xlu1 %850, %v460_v5   ;;  %v1265_v54 = vand.u32 127, %v344_v2  ;;  %vm541_vm7 = vcmask 130048   ;;  %v324_v5 = vld [vmem:[%s1058_s26 + $0x20] sm:$0xff] }
  0x3b   : > { %427 = vperm.xlu0 %849, %v1118_v32   ;;  %v604_v23 = vadd.f32 %v603_v6, %v602_v18 }
  0x3d   : > { %v606_v27 = vadd.f32 %v605_v20, %v604_v23  ;;  %v326_v20 = vld [vmem:[%s1058_s26 + $0x30] sm:$0xff] }
  0x3e   : > { %484 = vperm.xlu1 %850, %v461_v22  }
  0x3f   : > { %430 = vperm.xlu0 %849, %v1143_v41   ;;  %v608_v30 = vadd.f32 %v607_v26, %v606_v27  ;;  %v466_v41 = vsel %vm1223_vm5, 1, %v948_v3  ;;  %v327_v27 = vld [vmem:[%s1058_s26 + $0x38] sm:$0xff] }
  0x41   : > { %v610_v31 = vadd.f32 %v609_v28, %v608_v30 }
  0x42   : > { %487 = vperm.xlu1 %850, %v462_v29  }
  0x43   : > { %433 = vperm.xlu0 %849, %v340_v50   ;;  %v611_v32 = vrot.slane %v610_v31, 4 }
  0x45   : > { %v612_v33 = vadd.f32 %v611_v32, %v610_v31  ;;  %v328_v32 = vld [vmem:[%s1058_s26 + $0x40] sm:$0xff] }
  0x46   : > { %490 = vperm.xlu1 %850, %v463_v25  }
  0x47   : > { %436 = vperm.xlu0 %849, %v341_v61   ;;  %v613_v35 = vrot.slane %v612_v33, 2  ;;  %v322_v61 = vld [vmem:[%s1058_s26 + $0x10] sm:$0xff] }
  0x49   : > { %v614_v36 = vadd.f32 %v613_v35, %v612_v33 }
  0x4a   : > { %493 = vperm.xlu1 %850, %v464_v34  }
  0x4b   : > { %439 = vperm.xlu0 %849, %v342_v1   ;;  %v615_v38 = vrot.slane %v614_v36, 1  ;;  %v540_v1 = vld [vmem:[#allocation2] sm:$0x1] }
  0x4d   : > { %v616_v40 = vadd.f32 %v615_v38, %v614_v36  ;;  %v329_v38 = vld [vmem:[%s1058_s26 + $0x48] sm:$0xff] }
  0x4e   : > { %496 = vperm.xlu1 %850, %v465_v37  }
  0x4f   : > { %442 = vperm.xlu0 %849, %v343_v13   ;;  %v617_v42 = vadd.f32 %v616_v40, %v574_v39 }
  0x51   : > { %619 = vst.msk [vmem:[#allocation3] sm:$0x1] %vm618_vm2, %v617_v42 }
  0x52   : > { %499 = vperm.xlu1 %850, %v466_v41  }
  0x56   : > { %502 = vperm.xlu1 %850, %v467_v43  }
  0xa2   : > { %v410_v44 = vpop.permute.xlu0 %409 }
  0xa3   : > { %vm444_vm10 = vcmp.eq.s32.totalorder %v1265_v54, %v410_v44 }
  0xa6   : > { %v413_v45 = vpop.permute.xlu0 %412 }
  0xa7   : > { %vm445_vm12 = vcmp.eq.s32.totalorder %v1265_v54, %v413_v45 }
  0xa9   : > { %v470_v46 = vpop.permute.xlu1 %469 }
  0xaa   : > { %v416_v47 = vpop.permute.xlu0 %415  ;;  %vm504_vm11 = vcmp.eq.s32.totalorder %v470_v46, 1  ;;  %v330_v46 = vld [vmem:[%s1058_s26 + $0x50] sm:$0xff] }
  0xab   : > { %vm1274_vm15 = vmand %vm444_vm10, %vm504_vm11  ;;  %vm446_vm0 = vcmp.eq.s32.totalorder %v1265_v54, %v416_v47 }
  0xac   : > { %v528_v7 = vsel %vm1274_vm15, %v320_v60, 0.0 }
  0xad   : > { %v473_v48 = vpop.permute.xlu1 %472  ;;  %v542_v13 = vsel %vm541_vm7, %v528_v7, 0.0 }
  0xae   : > { %v419_v49 = vpop.permute.xlu0 %418  ;;  %vm505_vm8 = vcmp.eq.s32.totalorder %v473_v48, 1 }
  0xaf   : > { %vm1270_vm14 = vmand %vm445_vm12, %vm505_vm8  ;;  %vm447_vm4 = vcmp.eq.s32.totalorder %v1265_v54, %v419_v49 }
  0xb0   : > { %v529_v63 = vsel %vm1270_vm14, %v321_v56, 0.0 }
  0xb1   : > { %v476_v50 = vpop.permute.xlu1 %475  ;;  %v543_v10 = vsel %vm541_vm7, %v529_v63, 0.0 }
  0xb2   : > { %v422_v51 = vpop.permute.xlu0 %421  ;;  %vm506_vm13 = vcmp.eq.s32.totalorder %v476_v50, 1  ;;  %v544_v17 = vadd.f32 %v543_v10, %v542_v13 }
  0xb3   : > { %vm1281_vm3 = vmand %vm446_vm0, %vm506_vm13  ;;  %vm448_vm9 = vcmp.eq.s32.totalorder %v1265_v54, %v422_v51 }
  0xb4   : > { %v530_v8 = vsel %vm1281_vm3, %v322_v61, 0.0 }
  0xb5   : > { %v479_v52 = vpop.permute.xlu1 %478  ;;  %v545_v14 = vsel %vm541_vm7, %v530_v8, 0.0  ;;  %v626_v8 = vld [vmem:[#allocation3] sm:$0x1] (!%p771_p2) }
  0xb6   : > { %v425_v53 = vpop.permute.xlu0 %424  ;;  %vm507_vm1 = vcmp.eq.s32.totalorder %v479_v52, 1  ;;  %v546_v23 = vadd.f32 %v545_v14, %v544_v17  ;;  %627 = vst.msk [vmem:[%s308_s10] sm:$0x1] (!%p771_p2), %vm618_vm2, %v626_v8 }
  0xb7   : > { %vm1289_vm5 = vmand %vm447_vm4, %vm507_vm1  ;;  %vm449_vm11 = vcmp.eq.s32.totalorder %v1265_v54, %v425_v53 }
  0xb8   : > { %v531_v12 = vsel %vm1289_vm5, %v323_v0, 0.0 }
  0xb9   : > { %v482_v55 = vpop.permute.xlu1 %481  ;;  %v547_v19 = vsel %vm541_vm7, %v531_v12, 0.0 }
  0xba   : > { %v428_v3 = vpop.permute.xlu0 %427  ;;  %vm508_vm6 = vcmp.eq.s32.totalorder %v482_v55, 1  ;;  %v548_v30 = vadd.f32 %v547_v19, %v546_v23  ;;  %v331_v55 = vld [vmem:[%s1058_s26 + $0x58] sm:$0xff] }
  0xbb   : > { %vm1300_vm10 = vmand %vm448_vm9, %vm508_vm6  ;;  %vm450_vm14 = vcmp.eq.s32.totalorder %v1265_v54, %v428_v3 }
  0xbc   : > { %v532_v18 = vsel %vm1300_vm10, %v324_v5, 0.0 }
  0xbd   : > { %v485_v58 = vpop.permute.xlu1 %484  ;;  %v549_v26 = vsel %vm541_vm7, %v532_v18, 0.0 }
  0xbe   : > { %v431_v59 = vpop.permute.xlu0 %430  ;;  %vm509_vm8 = vcmp.eq.s32.totalorder %v485_v58, 1  ;;  %v550_v34 = vadd.f32 %v549_v26, %v548_v30 }
  0xbf   : > { %vm1310_vm13 = vmand %vm449_vm11, %vm509_vm8  ;;  %vm451_vm1 = vcmp.eq.s32.totalorder %v1265_v54, %v431_v59 }
  0xc0   : > { %v533_v24 = vsel %vm1310_vm13, %v325_v15, 0.0 }
  0xc1   : > { %v488_v4 = vpop.permute.xlu1 %487  ;;  %v551_v25 = vsel %vm541_vm7, %v533_v24, 0.0 }
  0xc2   : > { %v434_v9 = vpop.permute.xlu0 %433  ;;  %vm510_vm12 = vcmp.eq.s32.totalorder %v488_v4, 1  ;;  %v552_v40 = vadd.f32 %v551_v25, %v550_v34 }
  0xc3   : > { %vm1319_vm0 = vmand %vm450_vm14, %vm510_vm12  ;;  %vm452_vm4 = vcmp.eq.s32.totalorder %v1265_v54, %v434_v9 }
  0xc4   : > { %v534_v31 = vsel %vm1319_vm0, %v326_v20, 0.0 }
  0xc5   : > { %v491_v16 = vpop.permute.xlu1 %490  ;;  %v553_v36 = vsel %vm541_vm7, %v534_v31, 0.0 }
  0xc6   : > { %vm511_vm15 = vcmp.eq.s32.totalorder %v491_v16, 1  ;;  %v437_v22 = vpop.permute.xlu0 %436  ;;  %v554_v43 = vadd.f32 %v553_v36, %v552_v40 }
  0xc7   : > { %vm1328_vm3 = vmand %vm451_vm1, %vm511_vm15  ;;  %vm453_vm9 = vcmp.eq.s32.totalorder %v1265_v54, %v437_v22  ;;  %vm572_vm1 = vcmask 122880  }
  0xc8   : > { %v535_v35 = vsel %vm1328_vm3, %v327_v27, 0.0 }
  0xc9   : > { %v494_v29 = vpop.permute.xlu1 %493  ;;  %v555_v42 = vsel %vm541_vm7, %v535_v35, 0.0 }
  0xca   : > { %vm512_vm6 = vcmp.eq.s32.totalorder %v494_v29, 1  ;;  %v440_v37 = vpop.permute.xlu0 %439  ;;  %v556_v48 = vadd.f32 %v555_v42, %v554_v43 }
  0xcb   : > { %vm1337_vm5 = vmand %vm452_vm4, %vm512_vm6  ;;  %vm454_vm11 = vcmp.eq.s32.totalorder %v1265_v54, %v440_v37 }
  0xcc   : > { %v536_v41 = vsel %vm1337_vm5, %v328_v32, 0.0 }
  0xcd   : > { %v497_v39 = vpop.permute.xlu1 %496  ;;  %v557_v45 = vsel %vm541_vm7, %v536_v41, 0.0 }
  0xce   : > { %vm513_vm8 = vcmp.eq.s32.totalorder %v497_v39, 1  ;;  %v443_v50 = vpop.permute.xlu0 %442  ;;  %v558_v51 = vadd.f32 %v557_v45, %v556_v48 }
  0xcf   : > { %vm525_vm10 = vmand %vm453_vm9, %vm513_vm8  ;;  %vm455_vm14 = vcmp.eq.s32.totalorder %v1265_v54, %v443_v50 }
  0xd0   : > { %v537_v44 = vsel %vm525_vm10, %v329_v38, 0.0 }
  0xd1   : > { %v500_v47 = vpop.permute.xlu1 %499  ;;  %v559_v49 = vsel %vm541_vm7, %v537_v44, 0.0 }
  0xd2   : > { %vm514_vm12 = vcmp.eq.s32.totalorder %v500_v47, 1  ;;  %v560_v56 = vadd.f32 %v559_v49, %v558_v51 }
  0xd3   : > { %vm526_vm13 = vmand %vm454_vm11, %vm514_vm12 }
  0xd4   : > { %v538_v52 = vsel %vm526_vm13, %v330_v46, 0.0 }
  0xd5   : > { %v561_v53 = vsel %vm541_vm7, %v538_v52, 0.0  ;;  %v503_v3 = vpop.permute.xlu1 %502 }
  0xd6   : > { %vm515_vm15 = vcmp.eq.s32.totalorder %v503_v3, 1  ;;  %v562_v57 = vadd.f32 %v561_v53, %v560_v56 }
  0xd7   : > { %vm527_vm0 = vmand %vm455_vm14, %vm515_vm15 }
  0xd8   : > { %v539_v58 = vsel %vm527_vm0, %v331_v55, 0.0 }
  0xd9   : > { %v563_v2 = vsel %vm541_vm7, %v539_v58, 0.0 }
  0xda   : > { %v564_v59 = vadd.f32 %v563_v2, %v562_v57 }
  0xdc   : > { %v565_v60 = vrot.slane %v564_v59, 4 }
  0xde   : > { %v566_v61 = vadd.f32 %v565_v60, %v564_v59 }
  0xe0   : > { %v567_v62 = vrot.slane %v566_v61, 2 }
  0xe2   : > { %v568_v63 = vadd.f32 %v567_v62, %v566_v61 }
  0xe4   : > { %v569_v0 = vrot.slane %v568_v63, 1  ;;  %623 = sbr.rel (%p771_p2) target bundleno = 243 (0xf3), region = 36 }
  0xe6   : > { %v570_v4 = vadd.f32 %v569_v0, %v568_v63 }
  0xe8   : > { %v571_v7 = vadd.f32 %v570_v4, %v540_v1 }
  0xea   : > { %573 = vst.msk [vmem:[#allocation2] sm:$0x1] %vm572_vm1, %v571_v7 }
  0xf1   : > { %v624_v54 = vld [vmem:[#allocation2] sm:$0x1] }
  0xf2   : > { %625 = vst.msk [vmem:[%s1067_s22] sm:$0x1] %vm572_vm1, %v624_v54 }
  0xf3 PF: > { %s772_s4 = sshll.u32 %s933_s16, 4  ;;  %s644_s9 = sshll.u32 %s1067_s22, 4  ;;  %s645_s9 = int_to_ptr.vmem [resolvable:$true] %s644_s9 }
  0xf4   : > { %s1369_s8 = scalar_lea.hbm %s1421_s2, %s772_s4  ;;  %s1467_s11 = sand.u32 1, %s921_s13  }
  0xf5   : > { %s629_s20 = scalar_lea.sflag [#allocation5], %s1467_s11  ;;  %s851_s21 = scalar_lea.vmem %s645_s9, 16 }
  0xf6   : > { %p852_p4 = scmp.ne.s32.totalorder %s645_s9, %s851_s21  ;;  %s950_s6 = smov [#allocation4]  }
  0xf7   : > { %s855_s10 = sshll.u32 %s950_s6, 4  ;;  %s856_s10 = int_to_ptr.vmem [resolvable:$false] %s855_s10 }
  0xf8   : > { %p853_p5 = pnand %p852_p4, %p1020_p3  ;;  %s857_s26 = scalar_lea.vmem %s856_s10, 32 }
  0xf9   : > { %p858_p7 = scmp.lt.s32.totalorder %s645_s9, %s856_s10  ;;  %p859_p8 = scmp.lt.s32.totalorder %s857_s26, %s851_s21 }
  0xfa   : > { %p854_p6 = pneg %p853_p5 }
  0xfb   : > { %p860_p10 = por %p859_p8, %p858_p7 }
  0xfd   : > { %p861_p11 = pnand %p860_p10, %p854_p6 }
  0xff   : > { %864 = shalt.err (!%p861_p11)
}
 0x100   : > { %s865_s16 = scalar_lea.hbm %s1369_s8, 16  ;;  %s869_s30 = scalar_lea.hbm %s1421_s2, 32 }
 0x101   : > { %p866_p12 = scmp.ne.s32.totalorder %s1369_s8, %s865_s16  ;;  %p870_p1 = scmp.lt.u32.totalorder %s1369_s8, %s1421_s2 }
 0x102   : > { %p871_p2 = scmp.lt.u32.totalorder %s869_s30, %s865_s16  ;;  %p873_p5 = scmp.lt.u32.totalorder %s865_s16, %s1369_s8 }
 0x103   : > { %p867_p13 = pnand %p866_p12, %p1020_p3 }
 0x104   : > { %p872_p4 = por %p871_p2, %p870_p1 }
 0x105   : > { %p868_p0 = pneg %p867_p13 }
 0x106   : > { %p874_p6 = por %p873_p5, %p872_p4 }
 0x108   : > { %p875_p7 = pnand %p874_p6, %p868_p0 }
 0x10a   : > { %878 = shalt.err (!%p875_p7)
}
 0x10b   : > { %775 = dma.vmem_to_hbm [thread:$0]  (%p1020_p3), %s645_s9, 16, %s1369_s8, %s629_s20  }
 0x10c PF: > { %p781_p8 = scmp.ge.s32.totalorder %s945_s19, 2  ;;  %s659_s29 = sand.u32 1, %s917_s12  }
 0x10d   : > { %s660_s4 = scalar_lea.sflag [#allocation5], %s659_s29 }
 0x10e   : > { %p778_p10 = pnand %p781_p8, %p1030_p9 }
 0x110   : > { %912 = dma.done.wait (!%p778_p10), %s660_s4, 16  }
 0x111   : > { %914 = vsyncadd (!%p778_p10), %s660_s4, 4294967280  ;;  %s17_s19 = sadd.s32 1, %s945_s19   ;;  %s1468_s24 = sld [smem:[#allocation7_spill]] }
 0x112   : > { %p14_p11 = scmp.ge.s32.totalorder %s17_s19, 6   ;;  %s1469_s7 = sld [smem:[#allocation8_spill]] }
 0x113   : > { %s1470_s12 = smov %s921_s13  ;;  %s1471_s13 = smov %s925_s14 }
 0x114   : > { %s1472_s14 = smov %s1038_s28  ;;  %s1473_s15 = smov %s937_s17 }
 0x115   : > { %s1474_s16 = smov %s941_s18  ;;  %16 = sbr.rel (!%p14_p11) target bundleno = 5 (0x5), region = 86 }
 0x117   : > { %s1475_s17 = smov %s1468_s24 }
 0x118   : > { %s1476_s18 = smov %s1469_s7 }
 0x11c   :  { %670 = vsyncpa [#allocation5], 1 }
 0x11d   :  { %672 = vsyncpa [#allocation5 + $0x1], 1 }

</bundles_post_ra>
